<compile_context>
chip_gen: v7x
topology: tpu7x:2x2x1
jax: 0.10.0
libtpu: 0.0.40
codegen_flags: <defaults>
</compile_context>

<pallas_src>
import jax
import jax.numpy as jnp
from jax import lax
from jax.experimental import pallas as pl
from jax.experimental.pallas import tpu as pltpu

HIDDEN = 50
POINT_SIZE = HIDDEN + 2          # 52  (hidden rep ++ xy)
OBJECTS_SIZE = HIDDEN + HIDDEN   # 100 (hidden rep ++ global rep)
KEY_SIZE = 10
QUERY_SIZE = 10
VALUES_SIZE = HIDDEN             # 50
KV_SIZE = KEY_SIZE + VALUES_SIZE # 60
DK = 64
NORM = 1.0 / (KEY_SIZE ** 0.5)   # self.norm = 1/sqrt(key_size)
LN_EPS = 1e-5

# ---- packed-parameter slab layout (row offsets, 8-aligned; 150 lanes wide) ----
P_COLS = 3 * HIDDEN              # 150
R_WKV = 0                        # [52, 60]   key|values weights (fused)
R_WQ = 56                        # [100, 10]  query weights (pre-scaled by NORM)
R_WI = 160                       # [50, 150]  GRU input weights  [r|z|n]
R_WH = 216                       # [50, 150]  GRU hidden weights [r|z|n]
R_W1 = 272                       # [50, 64]   MLP layer 1
R_W2 = 328                       # [64, 50]   MLP layer 2
R_BIAS = 392                     # 8 bias/affine rows: b_kv,b_q,b_i,b_h,ln_g,ln_b,b1,b2
P_ROWS = 400


def slot_attention_kernel(point_in_ref, obj_in_ref, obj_hidden_ref, p_ref, out_ref):
    dot = lambda a, b: jnp.dot(a, b, preferred_element_type=jnp.float32)

    point_in = point_in_ref[...]          # [Np, 52]
    obj_in = obj_in_ref[...]              # [No, 100]
    h = obj_hidden_ref[...]               # [No, 50]

    # Static slices of the single packed parameter slab (zero-cost views).
    w_kv = p_ref[R_WKV:R_WKV + POINT_SIZE, 0:KV_SIZE]         # [52, 60]
    w_q = p_ref[R_WQ:R_WQ + OBJECTS_SIZE, 0:QUERY_SIZE]       # [100, 10]
    w_i = p_ref[R_WI:R_WI + HIDDEN, 0:3 * HIDDEN]             # [50, 150]
    w_h = p_ref[R_WH:R_WH + HIDDEN, 0:3 * HIDDEN]             # [50, 150]
    w1 = p_ref[R_W1:R_W1 + HIDDEN, 0:DK]                      # [50, 64]
    w2 = p_ref[R_W2:R_W2 + DK, 0:HIDDEN]                      # [64, 50]
    b_kv = p_ref[R_BIAS + 0:R_BIAS + 1, 0:KV_SIZE]            # [1, 60]
    b_q = p_ref[R_BIAS + 1:R_BIAS + 2, 0:QUERY_SIZE]          # [1, 10]
    b_i = p_ref[R_BIAS + 2:R_BIAS + 3, 0:3 * HIDDEN]          # [1, 150]
    b_h = p_ref[R_BIAS + 3:R_BIAS + 4, 0:3 * HIDDEN]          # [1, 150]
    ln_g = p_ref[R_BIAS + 4:R_BIAS + 5, 0:HIDDEN]             # [1, 50]
    ln_b = p_ref[R_BIAS + 5:R_BIAS + 6, 0:HIDDEN]             # [1, 50]
    b1 = p_ref[R_BIAS + 6:R_BIAS + 7, 0:DK]                   # [1, 64]
    b2 = p_ref[R_BIAS + 7:R_BIAS + 8, 0:HIDDEN]               # [1, 50]

    # Fused key/values projection (one MXU pass), query projection (NORM folded in).
    kv = dot(point_in, w_kv) + b_kv                           # [Np, 60]
    key = kv[:, 0:KEY_SIZE]                                   # [Np, 10]
    values = kv[:, KEY_SIZE:KV_SIZE]                          # [Np, 50]
    query = dot(obj_in, w_q) + b_q                            # [No, 10] (already * norm)

    # edge_function + node_update softmax over the mailbox (points) axis.
    logits = lax.dot_general(query, key, (((1,), (1,)), ((), ())),
                             preferred_element_type=jnp.float32)   # [No, Np]
    logits = logits - jnp.max(logits, axis=-1, keepdims=True)
    expw = jnp.exp(logits)
    denom = jnp.sum(expw, axis=-1, keepdims=True)
    attn = expw * pl.reciprocal(denom, approx=True)           # [No, Np]
    x = dot(attn, values)                                     # [No, 50] weighted sum

    # GRUCell(weighted_sum, hidden) with fused gate matmuls (2 instead of 6).
    gi = dot(x, w_i) + b_i                                    # [No, 150] = [r|z|n]
    gh = dot(h, w_h) + b_h                                    # [No, 150]
    r = jax.nn.sigmoid(gi[:, 0:HIDDEN] + gh[:, 0:HIDDEN])
    z = jax.nn.sigmoid(gi[:, HIDDEN:2 * HIDDEN] + gh[:, HIDDEN:2 * HIDDEN])
    n = jnp.tanh(gi[:, 2 * HIDDEN:3 * HIDDEN] + r * gh[:, 2 * HIDDEN:3 * HIDDEN])
    h_gru = (1.0 - z) * n + z * h                             # [No, 50]

    # LayerNorm over feature axis (biased variance, eps inside sqrt).
    mu = jnp.mean(h_gru, axis=-1, keepdims=True)
    xc = h_gru - mu
    var = jnp.mean(xc * xc, axis=-1, keepdims=True)
    h_ln = xc * lax.rsqrt(var + LN_EPS) * ln_g + ln_b

    # MLP: Linear(50,64) -> ReLU -> Linear(64,50)
    hid = jnp.maximum(dot(h_ln, w1) + b1, 0.0)
    mlp_out = dot(hid, w2) + b2

    # residual: new hidden rep = hidden rep + mlp(ln(gru(...)))
    out_ref[...] = h + mlp_out


def pack_params(params):
    """Pack all 23 parameter tensors into one [400, 150] f32 slab (one DMA)."""
    (wk, bk, wv, bv, wq, bq,
     w_ir, w_iz, w_in_, w_hr, w_hz, w_hn,
     b_ir, b_iz, b_in_, b_hr, b_hz, b_hn,
     ln_g, ln_b, w1, b1, w2, b2) = params

    def pad(a, rows=None):
        r, c = a.shape
        rows = r if rows is None else rows
        return jnp.pad(a, ((0, rows - r), (0, P_COLS - c)))

    w_kv = jnp.concatenate([wk, wv], axis=1)                  # [52, 60]
    b_kv = jnp.concatenate([bk, bv], axis=1)                  # [1, 60]
    w_qs = wq * NORM                                          # fold attention norm
    b_qs = bq * NORM
    w_i = jnp.concatenate([w_ir, w_iz, w_in_], axis=1)        # [50, 150]
    b_i = jnp.concatenate([b_ir, b_iz, b_in_], axis=1)        # [1, 150]
    w_h = jnp.concatenate([w_hr, w_hz, w_hn], axis=1)         # [50, 150]
    b_h = jnp.concatenate([b_hr, b_hz, b_hn], axis=1)         # [1, 150]

    slab = jnp.concatenate([
        pad(w_kv, 56),     # rows   0..55
        pad(w_qs, 104),    # rows  56..159
        pad(w_i, 56),      # rows 160..215
        pad(w_h, 56),      # rows 216..271
        pad(w1, 56),       # rows 272..327
        pad(w2, 64),       # rows 328..391
        pad(b_kv), pad(b_qs), pad(b_i), pad(b_h),
        pad(ln_g), pad(ln_b), pad(b1), pad(b2),               # rows 392..399
    ], axis=0)
    assert slab.shape == (P_ROWS, P_COLS)
    return slab


def slot_attention(point_inputs, objects_input, obj_hidden, packed_params):
    n_obj = obj_hidden.shape[0]
    vmem = pl.BlockSpec(memory_space=pltpu.MemorySpace.VMEM)
    return pl.pallas_call(
        slot_attention_kernel,
        out_shape=jax.ShapeDtypeStruct((n_obj, HIDDEN), jnp.float32),
        in_specs=[vmem, vmem, vmem, vmem],
        out_specs=vmem,
    )(point_inputs, objects_input, obj_hidden, packed_params)


def init_params(key):
    """Deterministic synthetic parameters (torch-style uniform fan-in init)."""
    def u(k, shape, fan_in):
        bound = 1.0 / (fan_in ** 0.5)
        return jax.random.uniform(k, shape, jnp.float32, -bound, bound)

    ks = iter(jax.random.split(key, 32))
    wk = u(next(ks), (POINT_SIZE, KEY_SIZE), POINT_SIZE)
    bk = u(next(ks), (1, KEY_SIZE), POINT_SIZE)
    wv = u(next(ks), (POINT_SIZE, VALUES_SIZE), POINT_SIZE)
    bv = u(next(ks), (1, VALUES_SIZE), POINT_SIZE)
    wq = u(next(ks), (OBJECTS_SIZE, QUERY_SIZE), OBJECTS_SIZE)
    bq = u(next(ks), (1, QUERY_SIZE), OBJECTS_SIZE)
    # GRUCell(input=50, hidden=50); weights stored already transposed for x @ W.
    gw = lambda: u(next(ks), (HIDDEN, VALUES_SIZE), VALUES_SIZE)
    gb = lambda: u(next(ks), (1, VALUES_SIZE), VALUES_SIZE)
    w_ir, w_iz, w_in_ = gw(), gw(), gw()
    w_hr, w_hz, w_hn = gw(), gw(), gw()
    b_ir, b_iz, b_in_ = gb(), gb(), gb()
    b_hr, b_hz, b_hn = gb(), gb(), gb()
    ln_g = jnp.ones((1, VALUES_SIZE), jnp.float32)
    ln_b = jnp.zeros((1, VALUES_SIZE), jnp.float32)
    w1 = u(next(ks), (HIDDEN, DK), HIDDEN)
    b1 = u(next(ks), (1, DK), HIDDEN)
    w2 = u(next(ks), (DK, HIDDEN), DK)
    b2 = u(next(ks), (1, HIDDEN), DK)
    return (wk, bk, wv, bv, wq, bq,
            w_ir, w_iz, w_in_, w_hr, w_hz, w_hn,
            b_ir, b_iz, b_in_, b_hr, b_hz, b_hn,
            ln_g, ln_b, w1, b1, w2, b2)


def reference(point_inputs, objects_input, obj_hidden, params):
    (wk, bk, wv, bv, wq, bq, w_ir, w_iz, w_in_, w_hr, w_hz, w_hn,
     b_ir, b_iz, b_in_, b_hr, b_hz, b_hn, ln_g, ln_b, w1, b1, w2, b2) = params
    key = point_inputs @ wk + bk
    values = point_inputs @ wv + bv
    query = objects_input @ wq + bq
    logits = (query @ key.T) * NORM
    attn = jax.nn.softmax(logits, axis=-1)
    x = attn @ values
    h = obj_hidden
    r = jax.nn.sigmoid(x @ w_ir + b_ir + h @ w_hr + b_hr)
    z = jax.nn.sigmoid(x @ w_iz + b_iz + h @ w_hz + b_hz)
    n = jnp.tanh(x @ w_in_ + b_in_ + r * (h @ w_hn + b_hn))
    h_gru = (1.0 - z) * n + z * h
    mu = h_gru.mean(-1, keepdims=True)
    var = ((h_gru - mu) ** 2).mean(-1, keepdims=True)
    h_ln = (h_gru - mu) / jnp.sqrt(var + LN_EPS) * ln_g + ln_b
    mlp = jnp.maximum(h_ln @ w1 + b1, 0.0) @ w2 + b2
    return h + mlp


if __name__ == "__main__":
    root = jax.random.PRNGKey(0)
    k_data, k_param = jax.random.split(root)
    kd = jax.random.split(k_data, 4)

    N_POINTS, N_OBJECTS = 16, 8
    points_hidden = jax.random.normal(kd[0], (N_POINTS, HIDDEN), jnp.float32)
    points_xy = jax.random.normal(kd[1], (N_POINTS, 2), jnp.float32)
    obj_hidden = jax.random.normal(kd[2], (N_OBJECTS, HIDDEN), jnp.float32)
    obj_global = jax.random.normal(kd[3], (N_OBJECTS, HIDDEN), jnp.float32)

    # Glue (concatenation of node features) stays in plain JAX.
    point_inputs = jnp.concatenate([points_hidden, points_xy], axis=1)   # [16, 52]
    objects_input = jnp.concatenate([obj_hidden, obj_global], axis=1)    # [8, 100]

    params = init_params(k_param)
    packed = pack_params(params)                                         # [400, 150]

    out = jax.block_until_ready(
        slot_attention(point_inputs, objects_input, obj_hidden, packed))
    ref = reference(point_inputs, objects_input, obj_hidden, params)

    assert out.shape == (N_OBJECTS, HIDDEN)
    assert bool(jnp.all(jnp.isfinite(out)))
    assert bool(jnp.allclose(out, ref, rtol=1e-2, atol=1e-2)), (
        float(jnp.max(jnp.abs(out - ref))))
    print("KERNEL_OK")
</pallas_src>

<mosaic_0001>
module attributes {stable_mosaic.version = 11 : i64} {
  func.func @slot_attention_kernel(%arg0: memref<16x52xf32, #tpu.memory_space<vmem>>, %arg1: memref<8x100xf32, #tpu.memory_space<vmem>>, %arg2: memref<8x50xf32, #tpu.memory_space<vmem>>, %arg3: memref<400x150xf32, #tpu.memory_space<vmem>>, %arg4: memref<8x50xf32, #tpu.memory_space<vmem>>) attributes {dimension_semantics = [], scalar_prefetch = 0 : i64, scratch_operands = 0 : i64, tpu.core_type = #tpu.core_type<tc>} {
    %c0 = arith.constant 0 : index
    %c0_0 = arith.constant 0 : index
    %0 = vector.load %arg0[%c0, %c0_0] : memref<16x52xf32, #tpu.memory_space<vmem>>, vector<16x52xf32>
    %c0_1 = arith.constant 0 : index
    %c0_2 = arith.constant 0 : index
    %1 = vector.load %arg1[%c0_1, %c0_2] : memref<8x100xf32, #tpu.memory_space<vmem>>, vector<8x100xf32>
    %c0_3 = arith.constant 0 : index
    %c0_4 = arith.constant 0 : index
    %2 = vector.load %arg2[%c0_3, %c0_4] : memref<8x50xf32, #tpu.memory_space<vmem>>, vector<8x50xf32>
    %c0_5 = arith.constant 0 : index
    %c0_6 = arith.constant 0 : index
    %3 = vector.load %arg3[%c0_5, %c0_6] : memref<400x150xf32, #tpu.memory_space<vmem>>, vector<52x60xf32>
    %c56 = arith.constant 56 : index
    %c0_7 = arith.constant 0 : index
    %4 = vector.load %arg3[%c56, %c0_7] : memref<400x150xf32, #tpu.memory_space<vmem>>, vector<100x10xf32>
    %c160 = arith.constant 160 : index
    %c0_8 = arith.constant 0 : index
    %5 = vector.load %arg3[%c160, %c0_8] : memref<400x150xf32, #tpu.memory_space<vmem>>, vector<50x150xf32>
    %c216 = arith.constant 216 : index
    %c0_9 = arith.constant 0 : index
    %6 = vector.load %arg3[%c216, %c0_9] : memref<400x150xf32, #tpu.memory_space<vmem>>, vector<50x150xf32>
    %c272 = arith.constant 272 : index
    %c0_10 = arith.constant 0 : index
    %7 = vector.load %arg3[%c272, %c0_10] : memref<400x150xf32, #tpu.memory_space<vmem>>, vector<50x64xf32>
    %c328 = arith.constant 328 : index
    %c0_11 = arith.constant 0 : index
    %8 = vector.load %arg3[%c328, %c0_11] : memref<400x150xf32, #tpu.memory_space<vmem>>, vector<64x50xf32>
    %c392 = arith.constant 392 : index
    %c0_12 = arith.constant 0 : index
    %9 = vector.load %arg3[%c392, %c0_12] : memref<400x150xf32, #tpu.memory_space<vmem>>, vector<1x60xf32>
    %c393 = arith.constant 393 : index
    %c0_13 = arith.constant 0 : index
    %10 = vector.load %arg3[%c393, %c0_13] : memref<400x150xf32, #tpu.memory_space<vmem>>, vector<1x10xf32>
    %c394 = arith.constant 394 : index
    %c0_14 = arith.constant 0 : index
    %11 = vector.load %arg3[%c394, %c0_14] : memref<400x150xf32, #tpu.memory_space<vmem>>, vector<1x150xf32>
    %c395 = arith.constant 395 : index
    %c0_15 = arith.constant 0 : index
    %12 = vector.load %arg3[%c395, %c0_15] : memref<400x150xf32, #tpu.memory_space<vmem>>, vector<1x150xf32>
    %c396 = arith.constant 396 : index
    %c0_16 = arith.constant 0 : index
    %13 = vector.load %arg3[%c396, %c0_16] : memref<400x150xf32, #tpu.memory_space<vmem>>, vector<1x50xf32>
    %c397 = arith.constant 397 : index
    %c0_17 = arith.constant 0 : index
    %14 = vector.load %arg3[%c397, %c0_17] : memref<400x150xf32, #tpu.memory_space<vmem>>, vector<1x50xf32>
    %c398 = arith.constant 398 : index
    %c0_18 = arith.constant 0 : index
    %15 = vector.load %arg3[%c398, %c0_18] : memref<400x150xf32, #tpu.memory_space<vmem>>, vector<1x64xf32>
    %c399 = arith.constant 399 : index
    %c0_19 = arith.constant 0 : index
    %16 = vector.load %arg3[%c399, %c0_19] : memref<400x150xf32, #tpu.memory_space<vmem>>, vector<1x50xf32>
    %cst = arith.constant dense<0.000000e+00> : vector<16x60xf32>
    %17 = tpu.matmul %0, %3, %cst {dimension_numbers = #tpu.dot_dimension_numbers<[1], [0], [0], [1], [0, 0, 1, 1], [], []>} : vector<16x52xf32>, vector<52x60xf32>, vector<16x60xf32> -> vector<16x60xf32>
    %18 = vector.broadcast %9 : vector<1x60xf32> to vector<16x60xf32>
    %19 = arith.addf %17, %18 : vector<16x60xf32>
    %20 = vector.extract_strided_slice %19 {offsets = [0, 0], sizes = [16, 10], strides = [1, 1]} : vector<16x60xf32> to vector<16x10xf32>
    %21 = vector.extract_strided_slice %19 {offsets = [0, 10], sizes = [16, 50], strides = [1, 1]} : vector<16x60xf32> to vector<16x50xf32>
    %cst_20 = arith.constant dense<0.000000e+00> : vector<8x10xf32>
    %22 = tpu.matmul %1, %4, %cst_20 {dimension_numbers = #tpu.dot_dimension_numbers<[1], [0], [0], [1], [0, 0, 1, 1], [], []>} : vector<8x100xf32>, vector<100x10xf32>, vector<8x10xf32> -> vector<8x10xf32>
    %23 = vector.broadcast %10 : vector<1x10xf32> to vector<8x10xf32>
    %24 = arith.addf %22, %23 : vector<8x10xf32>
    %cst_21 = arith.constant dense<0.000000e+00> : vector<8x16xf32>
    %25 = tpu.matmul %24, %20, %cst_21 {dimension_numbers = #tpu.dot_dimension_numbers<[1], [1], [0], [0], [0, 0, 1, 0], [], []>} : vector<8x10xf32>, vector<16x10xf32>, vector<8x16xf32> -> vector<8x16xf32>
    %cst_22 = arith.constant dense<0xFF800000> : vector<8xf32>
    %26 = vector.multi_reduction <maximumf>, %25, %cst_22 [1] : vector<8x16xf32> to vector<8xf32>
    %27 = vector.shape_cast %26 : vector<8xf32> to vector<8x1xf32>
    %28 = vector.broadcast %27 : vector<8x1xf32> to vector<8x16xf32>
    %29 = arith.subf %25, %28 : vector<8x16xf32>
    %30 = math.exp %29 : vector<8x16xf32>
    %cst_23 = arith.constant dense<0.000000e+00> : vector<8xf32>
    %31 = vector.multi_reduction <add>, %30, %cst_23 [1] : vector<8x16xf32> to vector<8xf32>
    %32 = vector.shape_cast %31 : vector<8xf32> to vector<8x1xf32>
    %33 = tpu.reciprocal %32 {approx = true} : vector<8x1xf32> -> vector<8x1xf32>
    %34 = vector.broadcast %33 : vector<8x1xf32> to vector<8x16xf32>
    %35 = arith.mulf %30, %34 : vector<8x16xf32>
    %cst_24 = arith.constant dense<0.000000e+00> : vector<8x50xf32>
    %36 = tpu.matmul %35, %21, %cst_24 {dimension_numbers = #tpu.dot_dimension_numbers<[1], [0], [0], [1], [0, 0, 1, 1], [], []>} : vector<8x16xf32>, vector<16x50xf32>, vector<8x50xf32> -> vector<8x50xf32>
    %cst_25 = arith.constant dense<0.000000e+00> : vector<8x150xf32>
    %37 = tpu.matmul %36, %5, %cst_25 {dimension_numbers = #tpu.dot_dimension_numbers<[1], [0], [0], [1], [0, 0, 1, 1], [], []>} : vector<8x50xf32>, vector<50x150xf32>, vector<8x150xf32> -> vector<8x150xf32>
    %38 = vector.broadcast %11 : vector<1x150xf32> to vector<8x150xf32>
    %39 = arith.addf %37, %38 : vector<8x150xf32>
    %cst_26 = arith.constant dense<0.000000e+00> : vector<8x150xf32>
    %40 = tpu.matmul %2, %6, %cst_26 {dimension_numbers = #tpu.dot_dimension_numbers<[1], [0], [0], [1], [0, 0, 1, 1], [], []>} : vector<8x50xf32>, vector<50x150xf32>, vector<8x150xf32> -> vector<8x150xf32>
    %41 = vector.broadcast %12 : vector<1x150xf32> to vector<8x150xf32>
    %42 = arith.addf %40, %41 : vector<8x150xf32>
    %43 = vector.extract_strided_slice %39 {offsets = [0, 0], sizes = [8, 50], strides = [1, 1]} : vector<8x150xf32> to vector<8x50xf32>
    %44 = vector.extract_strided_slice %42 {offsets = [0, 0], sizes = [8, 50], strides = [1, 1]} : vector<8x150xf32> to vector<8x50xf32>
    %45 = arith.addf %43, %44 : vector<8x50xf32>
    %46 = arith.negf %45 : vector<8x50xf32>
    %47 = math.exp %46 : vector<8x50xf32>
    %cst_27 = arith.constant 1.000000e+00 : f32
    %48 = vector.broadcast %cst_27 : f32 to vector<8x50xf32>
    %49 = arith.addf %48, %47 : vector<8x50xf32>
    %50 = arith.divf %48, %49 : vector<8x50xf32>
    %51 = vector.extract_strided_slice %39 {offsets = [0, 50], sizes = [8, 50], strides = [1, 1]} : vector<8x150xf32> to vector<8x50xf32>
    %52 = vector.extract_strided_slice %42 {offsets = [0, 50], sizes = [8, 50], strides = [1, 1]} : vector<8x150xf32> to vector<8x50xf32>
    %53 = arith.addf %51, %52 : vector<8x50xf32>
    %54 = arith.negf %53 : vector<8x50xf32>
    %55 = math.exp %54 : vector<8x50xf32>
    %cst_28 = arith.constant 1.000000e+00 : f32
    %56 = vector.broadcast %cst_28 : f32 to vector<8x50xf32>
    %57 = arith.addf %56, %55 : vector<8x50xf32>
    %58 = arith.divf %56, %57 : vector<8x50xf32>
    %59 = vector.extract_strided_slice %39 {offsets = [0, 100], sizes = [8, 50], strides = [1, 1]} : vector<8x150xf32> to vector<8x50xf32>
    %60 = vector.extract_strided_slice %42 {offsets = [0, 100], sizes = [8, 50], strides = [1, 1]} : vector<8x150xf32> to vector<8x50xf32>
    %61 = arith.mulf %50, %60 : vector<8x50xf32>
    %62 = arith.addf %59, %61 : vector<8x50xf32>
    %63 = math.tanh %62 : vector<8x50xf32>
    %cst_29 = arith.constant 1.000000e+00 : f32
    %64 = vector.broadcast %cst_29 : f32 to vector<8x50xf32>
    %65 = arith.subf %64, %58 : vector<8x50xf32>
    %66 = arith.mulf %65, %63 : vector<8x50xf32>
    %67 = arith.mulf %58, %2 : vector<8x50xf32>
    %68 = arith.addf %66, %67 : vector<8x50xf32>
    %cst_30 = arith.constant dense<0.000000e+00> : vector<8xf32>
    %69 = vector.multi_reduction <add>, %68, %cst_30 [1] : vector<8x50xf32> to vector<8xf32>
    %70 = vector.shape_cast %69 : vector<8xf32> to vector<8x1xf32>
    %cst_31 = arith.constant 5.000000e+01 : f32
    %71 = vector.broadcast %cst_31 : f32 to vector<8x1xf32>
    %72 = arith.divf %70, %71 : vector<8x1xf32>
    %73 = vector.broadcast %72 : vector<8x1xf32> to vector<8x50xf32>
    %74 = arith.subf %68, %73 : vector<8x50xf32>
    %75 = arith.mulf %74, %74 : vector<8x50xf32>
    %cst_32 = arith.constant dense<0.000000e+00> : vector<8xf32>
    %76 = vector.multi_reduction <add>, %75, %cst_32 [1] : vector<8x50xf32> to vector<8xf32>
    %77 = vector.shape_cast %76 : vector<8xf32> to vector<8x1xf32>
    %cst_33 = arith.constant 5.000000e+01 : f32
    %78 = vector.broadcast %cst_33 : f32 to vector<8x1xf32>
    %79 = arith.divf %77, %78 : vector<8x1xf32>
    %cst_34 = arith.constant 9.99999974E-6 : f32
    %80 = vector.broadcast %cst_34 : f32 to vector<8x1xf32>
    %81 = arith.addf %79, %80 : vector<8x1xf32>
    %82 = math.rsqrt %81 : vector<8x1xf32>
    %83 = vector.broadcast %82 : vector<8x1xf32> to vector<8x50xf32>
    %84 = arith.mulf %74, %83 : vector<8x50xf32>
    %85 = vector.broadcast %13 : vector<1x50xf32> to vector<8x50xf32>
    %86 = arith.mulf %84, %85 : vector<8x50xf32>
    %87 = vector.broadcast %14 : vector<1x50xf32> to vector<8x50xf32>
    %88 = arith.addf %86, %87 : vector<8x50xf32>
    %cst_35 = arith.constant dense<0.000000e+00> : vector<8x64xf32>
    %89 = tpu.matmul %88, %7, %cst_35 {dimension_numbers = #tpu.dot_dimension_numbers<[1], [0], [0], [1], [0, 0, 1, 1], [], []>} : vector<8x50xf32>, vector<50x64xf32>, vector<8x64xf32> -> vector<8x64xf32>
    %90 = vector.broadcast %15 : vector<1x64xf32> to vector<8x64xf32>
    %91 = arith.addf %89, %90 : vector<8x64xf32>
    %cst_36 = arith.constant 0.000000e+00 : f32
    %92 = vector.broadcast %cst_36 : f32 to vector<8x64xf32>
    %93 = arith.maximumf %91, %92 : vector<8x64xf32>
    %cst_37 = arith.constant dense<0.000000e+00> : vector<8x50xf32>
    %94 = tpu.matmul %93, %8, %cst_37 {dimension_numbers = #tpu.dot_dimension_numbers<[1], [0], [0], [1], [0, 0, 1, 1], [], []>} : vector<8x64xf32>, vector<64x50xf32>, vector<8x50xf32> -> vector<8x50xf32>
    %95 = vector.broadcast %16 : vector<1x50xf32> to vector<8x50xf32>
    %96 = arith.addf %94, %95 : vector<8x50xf32>
    %97 = arith.addf %2, %96 : vector<8x50xf32>
    %c0_38 = arith.constant 0 : index
    %c0_39 = arith.constant 0 : index
    %98 = vector.load %arg4[%c0_38, %c0_39] : memref<8x50xf32, #tpu.memory_space<vmem>>, vector<8x50xf32>
    tpu.vector_store %arg4[%c0_38, %c0_39], %97 {strides = array<i32>} : memref<8x50xf32, #tpu.memory_space<vmem>>, vector<8x50xf32>,
    return
  }
}

</mosaic_0001>

<bundles_post_ra>
// kernel: tpu_custom_call.1
= control target key start
LH: loop header
LB: loop body
LE: loop exit
PB: predicated region body
PF: predicated region fallthrough
CT: control target
= control target key end

     0   :  { %v1152_v3 = vmov 0.0|0.0   ;;  %vm1153_vm0 = vmmov 0   ;;  %v1154_v13 = vmov 0.0   ;;  %vm95_vm1 = vcmask 424960   ;;  %s1481_s0 = inlined_call_operand.vmem [shape: f32[16,52], index: 0, kind: input, shape index: {}]   ;;  %s1482_s1 = inlined_call_operand.vmem [shape: f32[8,100], index: 1, kind: input, shape index: {}]   ;;  %s1483_s2 = inlined_call_operand.vmem [shape: f32[8,50], index: 2, kind: input, shape index: {}]   ;;  %s1484_s3 = inlined_call_operand.vmem [shape: f32[400,150], index: 3, kind: input, shape index: {}]   ;;  %s1485_s4 = inlined_call_operand.hbm [shape: f32[8,50], index: 4, kind: output, shape index: {}]  }
   0x1   :  { %v22_v0 = vld [vmem:[%s1484_s3] sm:$0xff]  ;;  %v23_v1 = vld [vmem:[%s1484_s3 + $0x10] sm:$0xff]  ;;  %1030 = vmatprep.subr.bf16.mxu1 %v1152_v3  ;;  %965 = vmatprep.mubr.msk.f32.mxu1 %vm1153_vm0, %v1154_v13 }
   0x2   :  { %v29_v2 = vld [vmem:[%s1484_s3 + $0x70] sm:$0xff]  ;;  %v1018_v4 = vpack.c.bf16 %v23_v1, %v22_v0  ;;  %v30_v5 = vld [vmem:[%s1484_s3 + $0x80] sm:$0xff] }
   0x3   :  { %v24_v6 = vld [vmem:[%s1484_s3 + $0x20] sm:$0xff]  ;;  %v25_v7 = vld [vmem:[%s1484_s3 + $0x30] sm:$0xff]  ;;  %v1031_v8 = vpack.c.bf16 %v30_v5, %v29_v2 }
   0x4   :  { %v1022_v9 = vpack.c.bf16 %v25_v7, %v24_v6  ;;  %v31_v10 = vld [vmem:[%s1484_s3 + $0x90] sm:$0xff]  ;;  %v32_v11 = vld [vmem:[%s1484_s3 + $0xa0] sm:$0xff]  ;;  %1019 = vmatprep.subr.bf16.mxu0 %v1018_v4 }
   0x5   :  { %v26_v12 = vld [vmem:[%s1484_s3 + $0x40] sm:$0xff]  ;;  %v27_v14 = vld [vmem:[%s1484_s3 + $0x50] sm:$0xff]  ;;  %1032 = vmatpush3.bf16.msra.mxu1 %v1031_v8  ;;  %1021 = vmatpush3.bf16.msra.mxu0 %v1018_v4  ;;  %v1034_v15 = vpack.c.bf16 %v32_v11, %v31_v10 }
   0x6   :  { %1033 = vmatprep.subr.bf16.mxu1 %v1152_v3  ;;  %1023 = vmatprep.subr.bf16.mxu0 %v1022_v9  ;;  %v1026_v16 = vpack.c.bf16 %v27_v14, %v26_v12  ;;  %v33_v17 = vld [vmem:[%s1484_s3 + $0xb0] sm:$0xff]  ;;  %v34_v18 = vld [vmem:[%s1484_s3 + $0xc0] sm:$0xff] }
   0x7   :  { %v18_v19 = vld [vmem:[%s1481_s0] sm:$0xff] }
   0x8   :  { %936 = vmatprep.mubr.msk.f32.mxu0 %vm95_vm1, %v18_v19 }
   0x9   :  { %9 = vsyncpa [#allocation3], 0  ;;  %1035 = vmatpush3.bf16.msra.mxu1 %v1034_v15  ;;  %1025 = vmatpush3.bf16.msra.mxu0 %v1022_v9  ;;  %v1037_v20 = vpack.c.bf16 %v34_v18, %v33_v17  ;;  %v35_v21 = vld [vmem:[%s1484_s3 + $0xd0] sm:$0xff]  ;;  %v36_v22 = vld [vmem:[%s1484_s3 + $0xe0] sm:$0xff]  ;;  %vm102_vm2 = vcmask 1043456   ;;  %vm181_vm3 = vcmask 818176  }
   0xa   :  { %1036 = vmatprep.subr.bf16.mxu1 %v1152_v3  ;;  %1027 = vmatprep.subr.bf16.mxu0 %v1026_v16  ;;  %v28_v23 = vld [vmem:[%s1484_s3 + $0x60] sm:$0xf]  ;;  %v1040_v24 = vpack.c.bf16 %v36_v22, %v35_v21  ;;  %v37_v25 = vld [vmem:[%s1484_s3 + $0xf0] sm:$0xff]  ;;  %v19_v27 = vld [vmem:[%s1481_s0 + $0x8] sm:$0xff]  ;;  %vm258_vm4 = vcmask 80896   ;;  %s1155_s10 = smov 118  }
   0xb   :  { %v38_v26 = vld [vmem:[%s1484_s3 + $0x100] sm:$0xff]  ;;  %v39_v29 = vld [vmem:[%s1484_s3 + $0x110] sm:$0xff]  ;;  %vm1050_vm5 = vmpackc.low %vm258_vm4, %vm258_vm4  ;;  %vm338_vm6 = vcmask 130048   ;;  %vm444_vm7 = vcmask 1041408   ;;  %vm440_vm8 = vcmask 408576   ;;  %s1156_s15 = smov 28  }
   0xc   :  { %v1043_v28 = vpack.c.bf16 %v38_v26, %v37_v25  ;;  %v40_v30 = vld [vmem:[%s1484_s3 + $0x120] sm:$0xff]  ;;  %v41_v32 = vld [vmem:[%s1484_s3 + $0x130] sm:$0xf]  ;;  %v57_v57 = vld [vmem:[%s1484_s3 + $0x1b8] sm:$0xff]  ;;  %vm626_vm9 = vcmask 228352   ;;  %s1157_s18 = smov 100  }
   0xd   :  { %1038 = vmatpush3.bf16.msra.mxu1 %v1037_v20  ;;  %1029 = vmatpush3.bf16.msra.mxu0 %v1026_v16  ;;  %v1046_v31 = vpack.c.bf16 %v40_v30, %v39_v29  ;;  %v20_v33 = vld [vmem:[%s1482_s1] sm:$0xff]  ;;  %v85_v34 = vld [vmem:[%s1484_s3 + $0x310] ss:$0 sm:$0xff]  ;;  %v86_v41 = vld [vmem:[%s1484_s3 + $0x311] ss:$0 sm:$0xff]  ;;  %s1158_s19 = smov 78  }
   0xe   :  { %1039 = vmatprep.subr.bf16.mxu1 %v1152_v3  ;;  %934 = vmatprep.subr.msk.mxu0 %vm102_vm2, %v28_v23  ;;  %v59_v58 = vld [vmem:[%s1484_s3 + $0x1c8] sm:$0xff]  ;;  %v56_v59 = vld [vmem:[%s1484_s3 + $0x1b0] sm:$0xff]  ;;  %v58_v61 = vld [vmem:[%s1484_s3 + $0x1c0] sm:$0xff]  ;;  %s1159_s20 = smov 50   ;;  %vm645_vm10 = vcmask 637952   ;;  %vm765_vm11 = vcmask 523264  }
   0xf   :  { %v1067_v60 = vpack.c.bf16 %v59_v58, %v57_v57  ;;  %v61_v62 = vld [vmem:[%s1484_s3 + $0x1d8] sm:$0xff]  ;;  %v63_v63 = vld [vmem:[%s1484_s3 + $0x1e8] sm:$0xff]  ;;  %v1069_v0 = vpack.c.bf16 %v58_v61, %v56_v59  ;;  %v60_v2 = vld [vmem:[%s1484_s3 + $0x1d0] sm:$0xff]  ;;  %s1160_s29 = smov [#allocation2]  }
  0x10   :  { %v1071_v1 = vpack.c.bf16 %v63_v63, %v61_v62  ;;  %v62_v4 = vld [vmem:[%s1484_s3 + $0x1e0] sm:$0xff]  ;;  %v65_v5 = vld [vmem:[%s1484_s3 + $0x1f8] sm:$0xff]  ;;  %v67_v6 = vld [vmem:[%s1484_s3 + $0x208] sm:$0xff]  ;;  %s847_s30 = sshll.u32 %s1160_s29, 4  ;;  %s848_s30 = int_to_ptr.vmem [resolvable:$true] %s847_s30 }
  0x11   :  { %1041 = vmatpush3.bf16.msra.mxu1 %v1040_v24  ;;  %935 = vmatpush3.msk.msra.mxu0 %vm102_vm2, %v28_v23  ;;  %v1073_v7 = vpack.c.bf16 %v62_v4, %v60_v2  ;;  %v64_v8 = vld [vmem:[%s1484_s3 + $0x1f0] sm:$0xff]  ;;  %v1075_v9 = vpack.c.bf16 %v67_v6, %v65_v5  ;;  %v66_v10 = vld [vmem:[%s1484_s3 + $0x200] sm:$0xff]  ;;  %v43_v11 = vld [vmem:[%s1484_s3 + $0x148] sm:$0xff]  ;;  %s1128_s0 = scalar_lea.vmem %s848_s30, 128  ;;  %p1133_p1 = scmp.lt.s32.totalorder %s848_s30, %s848_s30 }
  0x12   :  { %937 = vmatmul.mubr.msk.f32.vlgmr.msra.gmra.mrb[0].mxu0 %vm95_vm1, %v19_v27  ;;  %1042 = vmatprep.subr.bf16.mxu1 %v1152_v3  ;;  %v45_v12 = vld [vmem:[%s1484_s3 + $0x158] sm:$0xff]  ;;  %v1077_v15 = vpack.c.bf16 %v66_v10, %v64_v8  ;;  %v68_v17 = vld [vmem:[%s1484_s3 + $0x210] sm:$0x3]  ;;  %v1336_v18 = vld [vmem:[%s1483_s2] sm:$0xff]  ;;  %p1129_p0 = scmp.ne.s32.totalorder %s848_s30, %s1128_s0  ;;  %p1134_p2 = scmp.lt.s32.totalorder %s1128_s0, %s1128_s0 }
  0x13   :  { %1048 = vmatprep.subr.bf16.mxu0 %v1152_v3  ;;  %972 = vmatprep.mubr.msk.f32.mxu0 %vm1153_vm0, %v1154_v13  ;;  %v1055_v14 = vpack.c.bf16 %v45_v12, %v43_v11  ;;  %v69_v16 = vld [vmem:[%s1484_s3 + $0x218] sm:$0x3]  ;;  %v42_v20 = vld [vmem:[%s1484_s3 + $0x140] sm:$0xff]  ;;  %v44_v21 = vld [vmem:[%s1484_s3 + $0x150] sm:$0xff] }
  0x14   :  { %v47_v22 = vld [vmem:[%s1484_s3 + $0x168] sm:$0xff]  ;;  %v49_v23 = vld [vmem:[%s1484_s3 + $0x178] sm:$0xff]  ;;  %v1057_v25 = vpack.c.bf16 %v44_v21, %v42_v20  ;;  %v48_v29 = vld [vmem:[%s1484_s3 + $0x170] sm:$0xff]  ;;  %p1135_p3 = por %p1134_p2, %p1133_p1 }
  0x15   :  { %1044 = vmatpush3.bf16.msra.mxu1 %v1043_v28  ;;  %v1059_v27 = vpack.c.bf16 %v49_v23, %v47_v22  ;;  %v46_v28 = vld [vmem:[%s1484_s3 + $0x160] sm:$0xff]  ;;  %v51_v30 = vld [vmem:[%s1484_s3 + $0x188] sm:$0xff]  ;;  %v91_v22 = vld [vmem:[%s1484_s3 + $0x314] ss:$0 sm:$0xff] }
  0x16   :  { %1045 = vmatprep.subr.bf16.mxu1 %v1152_v3  ;;  %p1136_p4 = pnand %p1135_p3, %p1129_p0 }
  0x19   :  { %1047 = vmatpush3.bf16.msra.mxu1 %v1046_v31  ;;  %v53_v31 = vld [vmem:[%s1484_s3 + $0x198] sm:$0xff] }
  0x1a   :  { %963 = vmatprep.subr.mxu1 %v1154_v13 }
  0x1d   :  { %964 = vmatpush3.msk.msra.mxu1 %vm102_vm2, %v41_v32  ;;  %v1061_v32 = vpack.c.bf16 %v48_v29, %v46_v28  ;;  %v92_v29 = vld [vmem:[%s1484_s3 + $0x315] ss:$0 sm:$0xff] }
  0x1e   :  { %966 = vmatmul.mubr.msk.f32.vlgmr.msra.gmra.mrb[0].mxu1 %vm181_vm3, %v20_v33  ;;  %1068 = vmatprep.subr.bf16.mxu1 %v1067_v60  ;;  %v1063_v33 = vpack.c.bf16 %v53_v31, %v51_v30  ;;  %v70_v30 = vld [vmem:[%s1484_s3 + $0x220] sm:$0xff]  ;;  %v71_v31 = vld [vmem:[%s1484_s3 + $0x230] sm:$0xff] }
  0x1f   :  { %606 = vmatprep.mubr.f32.mxu1 %v1154_v13  ;;  %1070 = vmatpush1.bf16.msra.mxu1 %v1069_v0 }
  0x20   :  { %1072 = vmatprep.subr.bf16.mxu1 %v1071_v1 }
  0x23   :  { %1074 = vmatpush1.bf16.msra.mxu1 %v1073_v7 }
  0x24   :  { %1076 = vmatprep.subr.bf16.mxu1 %v1075_v9 }
  0x27   :  { %1078 = vmatpush1.bf16.msra.mxu1 %v1077_v15 }
  0x28   :  { %869 = vmatprep.subr.msk.mxu1 %vm444_vm7, %v69_v16 }
  0x2b   :  { %870 = vmatpush1.msk.msra.mxu1 %vm444_vm7, %v68_v17 }
  0x2c   :  { %871 = vmatmul.mubr.msk.f32.vlgmr.msra.gmra.mrb[2].mxu1 %vm440_vm8, %v1336_v18  ;;  %1088 = vmatprep.subr.bf16.mxu1 %v1152_v3 }
  0x2d   :  { %1015 = vmatprep.mubr.msk.f32.mxu1 %vm1153_vm0, %v1154_v13 }
  0xe5   :  { %v938_v35 = vpop.f32.mrb[0].mxu0 }
  0xe6   :  { %v178_v36 = vadd.f32 %v938_v35, %v85_v34  ;;  %v172_v37 = vpop.f32.mrb[1].mxu0  ;;  %v52_v35 = vld [vmem:[%s1484_s3 + $0x190] sm:$0xff] }
  0xe7   :  { %v173_v38 = vadd.f32 %v172_v37, %v85_v34  ;;  %v50_v34 = vld [vmem:[%s1484_s3 + $0x180] sm:$0xff]  ;;  %v55_v37 = vld [vmem:[%s1484_s3 + $0x1a8] sm:$0x3] }
  0xe9   :  { %v1049_v39 = vpack.c.bf16 %v178_v36, %v173_v38  ;;  %v1109_v40 = vpack.i.bf16 %v178_v36, %v173_v38  ;;  %v1065_v36 = vpack.c.bf16 %v52_v35, %v50_v34  ;;  %v54_v38 = vld [vmem:[%s1484_s3 + $0x1a0] sm:$0x3]  ;;  %v73_v34 = vld [vmem:[%s1484_s3 + $0x250] sm:$0xff] }
  0xeb   :  { %1110 = vrot.lane.b32.xlu1 %v1109_v40, %s1155_s10  ;;  %1051 = vmatpush3.bf16.xpose.msk.msra.mxu0 %vm1050_vm5, %v1049_v39  ;;  %v430_v39 = vlaneseq }
  0xec   :  { %1052 = vmatprep.subr.bf16.mxu0 %v1152_v3 }
  0xed   :  { %v431_v40 = vshrl.u32 %v430_v39, 7  ;;  %v76_v39 = vld [vmem:[%s1484_s3 + $0x280] sm:$0x3] }
  0xf1   :  { %v254_v42 = vpop.f32.mrb[0].mxu1 }
  0xf2   :  { %v255_v43 = vadd.f32 %v254_v42, %v86_v41  ;;  %v967_v44 = vpop.f32.mrb[1].mxu1  ;;  %v432_v41 = vsub.s32 0, %v431_v40  ;;  %v856_v42 = vld [vmem:[%s1484_s3 + $0x313] ss:$8 sm:$0x3] }
  0xf4   :  { %973 = vmatmul.mubr.msk.f32.vlgmr.msra.gmra.mrb[2].mxu0 %vm258_vm4, %v255_v43  ;;  %v436_v43 = vsub.s32 1, %v431_v40  ;;  %v526_v44 = vrot.slane %v856_v42, %v432_v41 }
  0xf5   :  { %979 = vmatprep.mubr.msk.f32.mxu0 %vm1153_vm0, %v1154_v13 }
 0x15d   :  { %v1111_v45 = vpop.permute.xlu1 %1110 }
 0x15e   :  { %v1113_v46 = vunpack.i.h.bf16 %v1111_v45  ;;  %v1112_v47 = vunpack.i.l.bf16 %v1111_v45  ;;  %v530_v45 = vrot.slane %v856_v42, %v436_v43 }
 0x160   :  { %v1053_v48 = vpack.c.bf16 %v1113_v46, %v1112_v47  ;;  %v608_v46 = vpop.f32.mrb[2].mxu1 }
 0x161   :  { %v609_v47 = vadd.f32 %v608_v46, %v526_v44  ;;  %v78_v44 = vld [vmem:[%s1484_s3 + $0x2a0] sm:$0xff] }
 0x162   :  { %1054 = vmatpush3.bf16.msra.mxu0 %v1053_v48  ;;  %v610_v48 = vpop.f32.mrb[3].mxu1  ;;  %v80_v46 = vld [vmem:[%s1484_s3 + $0x2c0] sm:$0xff] }
 0x163   :  { %1056 = vmatprep.subr.bf16.mxu0 %v1055_v14  ;;  %622 = vrot.lane.b32.xlu1 %v609_v47, %s1156_s15 }
 0x1c7   :  { %v334_v49 = vpop.f32.mrb[2].mxu0 }
 0x1c8   :  { %v974_v50 = vpop.f32.mrb[3].mxu0  ;;  %v339_v51 = vsel %vm338_vm6, %v334_v49, -inf }
 0x1c9   :  { %340 = vmax.xlane.f32.xlu0 %v339_v51 }
 0x1d5   :  { %v623_v61 = vpop.permute.xlu1 %622 }
 0x256   :  { %v341_v52 = vpop.xlane.xlu0 %340 }
 0x257   :  { %v342_v53 = vsub.f32 %v334_v49, %v341_v52  ;;  %v611_v49 = vadd.f32 %v610_v48, %v530_v45  ;;  %v855_v52 = vld [vmem:[%s1484_s3 + $0x312] ss:$8 sm:$0x3] }
 0x258   :  { %v437_v2 = vrot.slane %v855_v52, %v436_v43  ;;  %v77_v43 = vld [vmem:[%s1484_s3 + $0x290] sm:$0xff] }
 0x259   :  { %v343_v54 = vmul.f32 1.442695, %v342_v53  ;;  %v433_v53 = vrot.slane %v855_v52, %v432_v41  ;;  %v1089_v45 = vpack.c.bf16 %v78_v44, %v77_v43  ;;  %v81_v48 = vld [vmem:[%s1484_s3 + $0x2d0] sm:$0xff] }
 0x25b   :  { %1114 = vpow2.f32 %v343_v54  ;;  %1090 = vmatpush3.bf16.msra.mxu1 %v1089_v45 }
 0x25c   :  { %1091 = vmatprep.subr.bf16.mxu1 %v1152_v3 }
 0x265   :  { %v1115_v55 = vpop.eup %1114 }
 0x266   :  { %v345_v56 = vsel %vm338_vm6, %v1115_v55, 0.0 }
 0x267   :  { %346 = vadd.xlane.f32.xlu0 %v345_v56 }
 0x27d   :  { %624 = vrot.lane.b32.xlu0 %v611_v49, %s1156_s15  ;;  %v82_v49 = vld [vmem:[%s1484_s3 + $0x2e0] sm:$0xff] }
 0x2f4   :  { %v347_v19 = vpop.xlane.xlu0 %346 }
 0x2f5   :  { %1116 = vrcp.f32 %v347_v19 }
 0x2f8   :  { %v625_v62 = vpop.permute.xlu0 %624 }
 0x2f9   :  { %v627_v63 = vsel %vm626_vm9, %v623_v61, %v625_v62  ;;  %v93_v61 = vld [vmem:[%s1484_s3 + $0x316] ss:$0 sm:$0xff] }
 0x2ff   :  { %v1117_v24 = vpop.eup %1116 }
 0x300   :  { %v349_v26 = vmul.f32 %v1117_v24, %v1115_v55 }
 0x302   :  { %980 = vmatmul.mubr.msk.f32.vlgmr.msra.gmra.mrb[4].mxu0 %vm338_vm6, %v349_v26 }
 0x303   :  { %1058 = vmatpush1.bf16.msra.mxu0 %v1057_v25  ;;  %515 = vmatprep.mubr.f32.mxu0 %v1154_v13 }
 0x304   :  { %1060 = vmatprep.subr.bf16.mxu0 %v1059_v27 }
 0x307   :  { %1062 = vmatpush1.bf16.msra.mxu0 %v1061_v32  ;;  %v72_v32 = vld [vmem:[%s1484_s3 + $0x240] sm:$0xff] }
 0x308   :  { %1064 = vmatprep.subr.bf16.mxu0 %v1063_v33  ;;  %v1080_v33 = vpack.c.bf16 %v71_v31, %v70_v30  ;;  %v1083_v35 = vpack.c.bf16 %v73_v34, %v72_v32 }
 0x30b   :  { %1066 = vmatpush1.bf16.msra.mxu0 %v1065_v36  ;;  %v74_v36 = vld [vmem:[%s1484_s3 + $0x260] sm:$0xff] }
 0x30c   :  { %866 = vmatprep.subr.msk.mxu0 %vm444_vm7, %v55_v37  ;;  %v75_v37 = vld [vmem:[%s1484_s3 + $0x270] sm:$0xff] }
 0x30f   :  { %867 = vmatpush1.msk.msra.mxu0 %vm444_vm7, %v54_v38  ;;  %v1086_v38 = vpack.c.bf16 %v75_v37, %v74_v36 }
 0x310   :  { %1079 = vmatprep.subr.bf16.mxu0 %v1152_v3 }
 0x3d5   :  { %v425_v50 = vpop.f32.mrb[4].mxu0 }
 0x3d6   :  { %v981_v51 = vpop.f32.mrb[5].mxu0  ;;  %868 = vmatmul.mubr.msk.f32.vlgmr.msra.gmra.mrb[6].mxu0 %vm440_vm8, %v425_v50 }
 0x3d7   :  { %996 = vmatprep.mubr.msk.f32.mxu0 %vm1153_vm0, %v1154_v13  ;;  %1081 = vmatpush3.bf16.msra.mxu0 %v1080_v33 }
 0x3d8   :  { %1082 = vmatprep.subr.bf16.mxu0 %v1152_v3 }
 0x3db   :  { %1084 = vmatpush3.bf16.msra.mxu0 %v1083_v35 }
 0x3dc   :  { %1085 = vmatprep.subr.bf16.mxu0 %v1152_v3 }
 0x3df   :  { %1087 = vmatpush3.bf16.msra.mxu0 %v1086_v38 }
 0x3e0   :  { %994 = vmatprep.subr.mxu0 %v1154_v13  ;;  %v79_v13 = vld [vmem:[%s1484_s3 + $0x2b0] sm:$0xff] }
 0x3e3   :  { %995 = vmatpush3.msk.msra.mxu0 %vm444_vm7, %v76_v39 }
 0x4a9   :  { %v517_v54 = vpop.f32.mrb[6].mxu0 }
 0x4aa   :  { %v518_v55 = vadd.f32 %v517_v54, %v433_v53  ;;  %v519_v56 = vpop.f32.mrb[7].mxu0  ;;  %v1095_v53 = vpack.c.bf16 %v82_v49, %v81_v48 }
 0x4ab   :  { %v520_v5 = vadd.f32 %v519_v56, %v437_v2 }
 0x4ac   :  { %v613_v57 = vadd.f32 %v609_v47, %v518_v55  ;;  %v1092_v47 = vpack.c.bf16 %v80_v46, %v79_v13 }
 0x4ae   :  { %v872_v58 = vmul.f32 -1.442695, %v613_v57  ;;  %1093 = vmatpush3.bf16.msra.mxu1 %v1092_v47 }
 0x4af   :  { %1094 = vmatprep.subr.bf16.mxu1 %v1152_v3 }
 0x4b0   :  { %1118 = vpow2.f32 %v872_v58  ;;  %v83_v58 = vld [vmem:[%s1484_s3 + $0x2f0] sm:$0xff] }
 0x4b2   :  { %1096 = vmatpush3.bf16.msra.mxu1 %v1095_v53 }
 0x4b3   :  { %1097 = vmatprep.subr.bf16.mxu1 %v1152_v3 }
 0x4ba   :  { %v1119_v59 = vpop.eup %1118 }
 0x4bb   :  { %v617_v60 = vadd.f32 1.0, %v1119_v59  ;;  %v84_v59 = vld [vmem:[%s1484_s3 + $0x300] sm:$0xff] }
 0x4bd   :  { %1120 = vrcp.f32 %v617_v60  ;;  %v1098_v60 = vpack.c.bf16 %v84_v59, %v83_v58 }
 0x4bf   :  { %1099 = vmatpush3.bf16.msra.mxu1 %v1098_v60 }
 0x4c7   :  { %v1121_v0 = vpop.eup %1120 }
 0x4c8   :  { %v629_v1 = vmul.f32 %v1121_v0, %v627_v63  ;;  %v638_v14 = vsub.f32 1.0, %v1121_v0 }
 0x4ca   :  { %631 = vrot.lane.b32.xlu1 %v629_v1, %s1157_s18  ;;  %v94_v1 = vld [vmem:[%s1484_s3 + $0x317] ss:$0 sm:$0xff] }
 0x53c   :  { %v632_v4 = vpop.permute.xlu1 %631 }
 0x53d   :  { %v634_v6 = vadd.f32 %v632_v4, %v518_v55  ;;  %v635_v7 = vadd.f32 %v632_v4, %v520_v5 }
 0x53f   :  { %1122 = vtanh.f32 %v634_v6 }
 0x540   :  { %1124 = vtanh.f32 %v635_v7 }
 0x549   :  { %v1123_v8 = vpop.eup %1122 }
 0x54a   :  { %641 = vrot.lane.b32.xlu1 %v1123_v8, %s1158_s19  ;;  %v1125_v9 = vpop.eup %1124 }
 0x54e   :  { %643 = vrot.lane.b32.xlu1 %v1125_v9, %s1158_s19 }
 0x552   :  { %649 = vrot.lane.b32.xlu1 %v1336_v18, %s1159_s20 }
 0x5bc   :  { %v642_v10 = vpop.permute.xlu1 %641 }
 0x5c0   :  { %v644_v11 = vpop.permute.xlu1 %643 }
 0x5c1   :  { %v646_v12 = vsel %vm645_vm10, %v642_v10, %v644_v11 }
 0x5c2   :  { %v648_v16 = vmul.f32 %v646_v12, %v638_v14 }
 0x5c4   :  { %v650_v15 = vpop.permute.xlu1 %649 }
 0x5c5   :  { %v652_v17 = vmul.f32 %v1121_v0, %v650_v15 }
 0x5c7   :  { %v653_v19 = vadd.f32 %v652_v17, %v648_v16 }
 0x5c9   :  { %655 = vrot.lane.b32.xlu1 %v653_v19, %s1158_s19 }
 0x63b   :  { %v656_v20 = vpop.permute.xlu1 %655 }
 0x63c   :  { %v658_v21 = vsel %vm440_vm8, %v656_v20, 0.0 }
 0x63d   :  { %659 = vadd.xlane.f32.xlu1 %v658_v21 }
 0x64e   :  { %677 = vrot.lane.b32.xlu1 %v91_v22, %s1159_s20 }
 0x6ca   :  { %v660_v23 = vpop.xlane.xlu1 %659 }
 0x6cb   :  { %v662_v24 = vmul.f32 0.02, %v660_v23 }
 0x6cd   :  { %v663_v25 = vsub.f32 %v653_v19, %v662_v24 }
 0x6ce   :  { %v678_v51 = vpop.permute.xlu1 %677 }
 0x6cf   :  { %v664_v26 = vmul.f32 %v663_v25, %v663_v25 }
 0x6d1   :  { %666 = vrot.lane.b32.xlu0 %v664_v26, %s1158_s19 }
 0x743   :  { %v667_v27 = vpop.permute.xlu0 %666 }
 0x744   :  { %v669_v28 = vsel %vm440_vm8, %v667_v27, 0.0 }
 0x745   :  { %670 = vadd.xlane.f32.xlu0 %v669_v28 }
 0x75b   :  { %682 = vrot.lane.b32.xlu0 %v92_v29, %s1159_s20 }
 0x7d2   :  { %v671_v40 = vpop.xlane.xlu0 %670 }
 0x7d3   :  { %v672_v41 = vmul.f32 0.02, %v671_v40 }
 0x7d5   :  { %v673_v42 = vadd.f32 1e-05, %v672_v41 }
 0x7d6   :  { %v683_v54 = vpop.permute.xlu0 %682 }
 0x7d7   :  { %1126 = vrsqrt.f32 %v673_v42 }
 0x7e1   :  { %v1127_v50 = vpop.eup %1126 }
 0x7e2   :  { %v675_v52 = vmul.f32 %v1127_v50, %v663_v25 }
 0x7e4   :  { %v680_v55 = vmul.f32 %v678_v51, %v675_v52 }
 0x7e6   :  { %v685_v56 = vadd.f32 %v683_v54, %v680_v55 }
 0x7e8   :  { %687 = vrot.lane.b32.xlu1 %v685_v56, %s1158_s19 }
 0x85a   :  { %v688_v57 = vpop.permute.xlu1 %687 }
 0x85b   :  { %997 = vmatmul.mubr.msk.f32.vlgmr.msra.gmra.mrb[8].mxu0 %vm440_vm8, %v688_v57 }
 0x92e   :  { %v760_v3 = vpop.f32.mrb[8].mxu0 }
 0x92f   :  { %v761_v62 = vadd.f32 %v760_v3, %v93_v61  ;;  %v998_v63 = vpop.f32.mrb[9].mxu0 }
 0x931   :  { %v764_v0 = vmax.f32 %v761_v62, 0.0 }
 0x933   :  { %1016 = vmatmul.mubr.msk.f32.vlgmr.msra.gmra.mrb[4].mxu1 %vm765_vm11, %v764_v0 }
 0xa06   :  { %v835_v2 = vpop.f32.mrb[4].mxu1 }
 0xa07   :  { %v836_v4 = vadd.f32 %v835_v2, %v94_v1  ;;  %v1017_v5 = vpop.f32.mrb[5].mxu1 }
 0xa09   :  { %v839_v6 = vadd.f32 %v836_v4, %v1336_v18 }
 0xa0b   :  { %840 = vst.msk [vmem:[#allocation2] sm:$0xff] %vm440_vm8, %v839_v6 }
 0xa0c   :  { %1139 = shalt.err (!%p1136_p4)
}
 0xa0d   :  { %s1140_s3 = scalar_lea.hbm %s1485_s4, 128 }
 0xa0e   :  { %p1141_p5 = scmp.ne.s32.totalorder %s1485_s4, %s1140_s3  ;;  %p1144_p6 = scmp.lt.u32.totalorder %s1140_s3, %s1485_s4 }
 0xa10   :  { %p1146_p7 = pnand %p1144_p6, %p1141_p5 }
 0xa12   :  { %1149 = shalt.err (!%p1146_p7)
}
 0xa13   :  { %850 = dma.vmem_to_hbm [thread:$0]  %s848_s30, 128, %s1485_s4, [#allocation3]  }
 0xa14   :  { %1150 = dma.done.wait [#allocation3], 128  }
 0xa15   :  { %1151 = vsyncadd [#allocation3], 4294967168 }
 0xa16   :  { %854 = vsyncpa [#allocation3], 1 }

</bundles_post_ra>
